<compile_context>
chip_gen: v7x
topology: tpu7x:2x2x1
jax: 0.10.0
libtpu: 0.0.40
codegen_flags: <defaults>
</compile_context>

<pallas_src>
import math

import jax
import jax.numpy as jnp
from jax.experimental import pallas as pl
from jax.experimental.pallas import tpu as pltpu


def _gfp_kernel(x_ref, w_ref, out_ref):
    # x_ref: (1, TB) f32 lane-dense, w_ref: (1, Hp) f32, out_ref: (TB, 2*Hp)
    Hp = w_ref.shape[1]
    # Apply the 2*pi scale to the small W row (O(Hp) VPU work per step).
    w_scaled = w_ref[...] * (2.0 * math.pi)                 # (1, Hp)
    # Lane->sublane transpose of the thin x row (XLU slot is idle here).
    x_col = jnp.transpose(x_ref[...], (1, 0))               # (TB, 1)
    x_proj = x_col * w_scaled                                # (TB, Hp) outer product
    # Both half-stores are lane-aligned: Hp is a multiple of 128 (wrapper pads W).
    out_ref[:, :Hp] = jnp.sin(x_proj).astype(out_ref.dtype)
    out_ref[:, Hp:] = jnp.cos(x_proj).astype(out_ref.dtype)


def _choose_block_b(B, H_pad, out_itemsize):
    # Genuinely tiny batches: one step; pipeline overhead would dominate.
    if B < 512:
        return B
    # Per-step VMEM (approx):
    #   2 * block_b * 2*H_pad * itemsize   (double-buffered output tile)
    # + ~3 * block_b * H_pad * 4           (x_proj / sin / cos f32 temporaries)
    # + negligible x (lane-dense) and W tiles.
    # ~3 MiB per output buffer keeps the total near ~11 MiB: safe under v5e's
    # 16 MiB scoped-VMEM default and well inside v7x's 64 MiB physical.
    budget_bytes = 3 << 20
    cap_budget = budget_bytes // max(2 * H_pad * out_itemsize, 1)
    # Guarantee >= 4 grid steps: overlaps writeback of step i-1 with sin/cos of
    # step i and lets dimension_semantics=("parallel",) shard across v7x's 2 TCs.
    cap_steps = B // 4
    block_b = min(cap_budget, cap_steps, 2048)
    # x is lane-dense (1, block_b): block lane width must be a multiple of 128.
    # (A multiple of 128 also satisfies 16/32-row sublane packing for bf16/int8
    # output tiles.)
    block_b = max(128, (block_b // 128) * 128)
    return block_b


def gaussian_fourier_projection(x, W, *, out_dtype=jnp.float32, block_b=None):
    """x: (B,) float, W: (H,) float  ->  (B, 2H) out_dtype."""
    B = x.shape[0]
    H = W.shape[0]

    # Pad W up to a multiple of 128 so both the sin-half and cos-half stores
    # stay lane-aligned (no-op for the typical embedding_size=256 -> H=128).
    H_pad = ((H + 127) // 128) * 128
    w2 = W.astype(jnp.float32).reshape(1, H)
    if H_pad != H:
        w2 = jnp.pad(w2, ((0, 0), (0, H_pad - H)))
    # Lane-dense x: avoids a (block_b, 1) tile padded to 128 lanes and its
    # 4-bytes-per-sublane strided DMA.
    x2 = x.astype(jnp.float32).reshape(1, B)

    itemsize = jnp.dtype(out_dtype).itemsize
    if block_b is None:
        block_b = _choose_block_b(B, H_pad, itemsize)
    if block_b != B:
        assert block_b % 128 == 0, "tiled block_b must be a multiple of 128"

    grid = (pl.cdiv(B, block_b),)

    cost = pl.CostEstimate(
        flops=2 * B * H_pad,                      # scale + outer-product multiply
        transcendentals=2 * B * H_pad,            # sin + cos per element
        bytes_accessed=4 * (B + H_pad) + 2 * B * H_pad * itemsize,
    )

    out = pl.pallas_call(
        _gfp_kernel,
        out_shape=jax.ShapeDtypeStruct((B, 2 * H_pad), out_dtype),
        grid=grid,
        in_specs=[
            pl.BlockSpec((1, block_b), lambda i: (0, i)),   # lane-dense x tile
            pl.BlockSpec((1, H_pad), lambda i: (0, 0)),     # W stays resident
        ],
        out_specs=pl.BlockSpec((block_b, 2 * H_pad), lambda i: (i, 0)),
        compiler_params=pltpu.CompilerParams(
            dimension_semantics=("parallel",),              # megacore-friendly
            vmem_limit_bytes=32 * (1 << 20),                # safe on v5e/v6e/v7x
        ),
        cost_estimate=cost,
    )(x2, w2)

    if H_pad != H:
        # Drop the padded columns of each half (only for atypical H % 128 != 0).
        out = jnp.concatenate([out[:, :H], out[:, H_pad:H_pad + H]], axis=-1)
    return out


if __name__ == "__main__":
    key = jax.random.PRNGKey(0)
    kx, kw, kx2 = jax.random.split(key, 3)

    embedding_size = 256          # -> W has embedding_size // 2 = 128 entries
    scale = 1.0
    H = embedding_size // 2

    # Deterministic parameter init, mirroring torch.randn(embedding_size//2)*scale
    W = jax.random.normal(kw, (H,), dtype=jnp.float32) * scale

    def ref_fn(xv, Wv):
        x_proj = xv[:, None] * Wv[None, :] * 2.0 * math.pi
        return jnp.concatenate([jnp.sin(x_proj), jnp.cos(x_proj)], axis=-1)

    # Typical tiny batch: single grid step.
    x = jax.random.normal(kx, (8,), dtype=jnp.float32)
    emb = jax.block_until_ready(gaussian_fourier_projection(x, W))
    assert emb.shape == (8, embedding_size)
    assert jnp.allclose(emb, ref_fn(x, W), atol=1e-4, rtol=1e-4)

    # Tiled path with a partial last tile (B not a multiple of block_b).
    xb = jax.random.normal(kx2, (300,), dtype=jnp.float32)
    emb_b = jax.block_until_ready(gaussian_fourier_projection(xb, W, block_b=128))
    assert emb_b.shape == (300, embedding_size)
    assert jnp.allclose(emb_b, ref_fn(xb, W), atol=1e-4, rtol=1e-4)

    print("KERNEL_OK")
</pallas_src>

<mosaic_0001>
module attributes {stable_mosaic.version = 11 : i64} {
  func.func @_gfp_kernel(%arg0: i32, %arg1: memref<1x8xf32, #tpu.memory_space<vmem>>, %arg2: memref<1x128xf32, #tpu.memory_space<vmem>>, %arg3: memref<8x256xf32, #tpu.memory_space<vmem>>) attributes {dimension_semantics = [#tpu.dimension_semantics<parallel>], iteration_bounds = array<i64: 1>, scalar_prefetch = 0 : i64, scratch_operands = 0 : i64, tpu.core_type = #tpu.core_type<tc>, window_params = [{transform_indices = @transform_0, window_bounds = array<i64: 1, 8>}, {pipeline_mode = #tpu.pipeline_mode<synchronous>, transform_indices = @transform_1, window_bounds = array<i64: 1, 128>}, {transform_indices = @transform_2, window_bounds = array<i64: 8, 256>}]} {
    %c0 = arith.constant 0 : index
    %c0_0 = arith.constant 0 : index
    %0 = vector.load %arg2[%c0, %c0_0] : memref<1x128xf32, #tpu.memory_space<vmem>>, vector<1x128xf32>
    %cst = arith.constant 6.28318548 : f32
    %1 = vector.broadcast %cst : f32 to vector<1x128xf32>
    %2 = arith.mulf %0, %1 : vector<1x128xf32>
    %c0_1 = arith.constant 0 : index
    %c0_2 = arith.constant 0 : index
    %3 = vector.load %arg1[%c0_1, %c0_2] : memref<1x8xf32, #tpu.memory_space<vmem>>, vector<1x8xf32>
    %4 = tpu.transpose %3, [1, 0] : vector<1x8xf32> -> vector<8x1xf32>
    %5 = vector.broadcast %4 : vector<8x1xf32> to vector<8x128xf32>
    %6 = vector.broadcast %2 : vector<1x128xf32> to vector<8x128xf32>
    %7 = arith.mulf %5, %6 : vector<8x128xf32>
    %8 = math.sin %7 : vector<8x128xf32>
    %c0_3 = arith.constant 0 : index
    %c0_4 = arith.constant 0 : index
    %9 = vector.load %arg3[%c0_3, %c0_4] : memref<8x256xf32, #tpu.memory_space<vmem>>, vector<8x128xf32>
    tpu.vector_store %arg3[%c0_3, %c0_4], %8 {strides = array<i32>} : memref<8x256xf32, #tpu.memory_space<vmem>>, vector<8x128xf32>,
    %10 = math.cos %7 : vector<8x128xf32>
    %c0_5 = arith.constant 0 : index
    %c128 = arith.constant 128 : index
    %11 = vector.load %arg3[%c0_5, %c128] : memref<8x256xf32, #tpu.memory_space<vmem>>, vector<8x128xf32>
    tpu.vector_store %arg3[%c0_5, %c128], %10 {strides = array<i32>} : memref<8x256xf32, #tpu.memory_space<vmem>>, vector<8x128xf32>,
    return
  }
  func.func @transform_0(%arg0: i32) -> (i32, i32) {
    %c0_i32 = arith.constant 0 : i32
    %c0_i32_0 = arith.constant 0 : i32
    return %c0_i32, %arg0 : i32, i32
  }
  func.func @transform_1(%arg0: i32) -> (i32, i32) {
    %c0_i32 = arith.constant 0 : i32
    %c0_i32_0 = arith.constant 0 : i32
    %c0_i32_1 = arith.constant 0 : i32
    return %c0_i32, %c0_i32_0 : i32, i32
  }
  func.func @transform_2(%arg0: i32) -> (i32, i32) {
    %c0_i32 = arith.constant 0 : i32
    %c0_i32_0 = arith.constant 0 : i32
    return %arg0, %c0_i32 : i32, i32
  }
}

</mosaic_0001>

<bundles_post_ra>
// kernel: tpu_custom_call.1
= control target key start
LH: loop header
LB: loop body
LE: loop exit
PB: predicated region body
PF: predicated region fallthrough
CT: control target
= control target key end

     0   :  { %7 = vsyncpa [#allocation3], 0  ;;  %s442_s0 = inlined_call_operand.hbm [shape: f32[1,8], index: 0, kind: input, shape index: {}]   ;;  %s443_s1 = inlined_call_operand.vmem [shape: f32[1,128], index: 1, kind: input, shape index: {}]   ;;  %s444_s2 = inlined_call_operand.hbm [shape: f32[8,256], index: 2, kind: output, shape index: {}]  }
   0x1   :  { %8 = vsyncpa [#allocation4], 0  ;;  %s370_s9 = smov [#allocation2]   ;;  %s322_s13 = scalar_lea.hbm %s442_s0, 16 }
   0x2   :  { %s15_s10 = sshll.u32 %s370_s9, 4  ;;  %p323_p0 = scmp.ne.s32.totalorder %s442_s0, %s322_s13  ;;  %s16_s10 = int_to_ptr.vmem [resolvable:$true] %s15_s10 }
   0x3   :  { %p326_p1 = scmp.lt.u32.totalorder %s322_s13, %s442_s0 }
   0x5   :  { %p328_p2 = pnand %p326_p1, %p323_p0 }
   0x7   :  { %331 = shalt.err (!%p328_p2)
}
   0x8   :  { %s332_s18 = scalar_lea.vmem %s16_s10, 16  ;;  %s336_s19 = scalar_lea.vmem %s16_s10, 32 }
   0x9   :  { %p333_p3 = scmp.ne.s32.totalorder %s16_s10, %s332_s18  ;;  %p337_p4 = scmp.lt.s32.totalorder %s16_s10, %s16_s10 }
   0xa   :  { %p338_p5 = scmp.lt.s32.totalorder %s336_s19, %s332_s18 }
   0xc   :  { %p339_p6 = por %p338_p5, %p337_p4 }
   0xe   :  { %p340_p7 = pnand %p339_p6, %p333_p3 }
  0x10   :  { %343 = shalt.err (!%p340_p7)
}
  0x11   :  { %18 = dma.hbm_to_vmem [thread:$0]  %s442_s0, 16, %s16_s10, [#allocation3]  }
  0x12   :  { %366 = dma.done.wait [#allocation3], 16  }
  0x13   :  { %367 = vsyncadd [#allocation3], 4294967280  ;;  %v26_v0 = vld [vmem:[#allocation2] sm:$0x1]  ;;  %v371_v1 = vmov 0   ;;  %v65_v3 = vlaneseq  ;;  %s378_s0 = smov [#allocation5]  }
  0x14   :  { %27 = vxpose.xlu0.b32.start.end [1/1] (short) (narrow) %v26_v0, 8  ;;  %v24_v5 = vld [vmem:[%s443_s1] sm:$0x1]  ;;  %v372_v21 = vmov 683565275   ;;  %s286_s1 = sshll.u32 %s378_s0, 4  ;;  %s287_s1 = int_to_ptr.vmem [resolvable:$true] %s286_s1 }
  0x15   :  { %v66_v4 = vshrl.u32 %v65_v3, 7  ;;  %v25_v7 = vmul.f32 6.2831855, %v24_v5  ;;  %v373_v23 = vmov 2475754826   ;;  %s344_s24 = scalar_lea.vmem %s287_s1, 256  ;;  %p349_p9 = scmp.lt.s32.totalorder %s287_s1, %s287_s1 }
  0x16   :  { %v374_v26 = vmov 2131351028   ;;  %v375_v29 = vmov 2102212464   ;;  %v376_v32 = vmov 920167782   ;;  %p345_p8 = scmp.ne.s32.totalorder %s287_s1, %s344_s24  ;;  %p350_p10 = scmp.lt.s32.totalorder %s344_s24, %s344_s24 }
  0x17   :  { %v67_v6 = vsub.s32 0, %v66_v4  ;;  %v377_v35 = vmov 1326507024  }
  0x18   :  { %p351_p11 = por %p350_p10, %p349_p9 }
  0x19   :  { %v68_v8 = vrot.slane %v25_v7, %v67_v6 }
  0x1a   :  { %p352_p12 = pnand %p351_p11, %p345_p8 }
  0x3d   :  { %317 = vset.pattern.permute.xlu0 %v371_v1 }
  0x94   :  { %v43_v2 = vpop.trf.xlu0 }
  0x95   :  { %61 = vperm.xlu0 %317, %v43_v2  }
 0x114   :  { %v62_v9 = vpop.permute.xlu0 %61 }
 0x115   :  { %v409_v10 = vmul.f32 %v68_v8, %v62_v9 }
 0x117   :  { %v74_v11 = vand.u32 2139095040, %v409_v10  ;;  %v71_v15 = vand.u32 2147483647, %v409_v10  ;;  %vm73_vm7 = vcmp.lt.s32.totalorder %v409_v10, 0  ;;  %vm163_vm15 = vweird.f32 %v409_v10 }
 0x119   :  { %v75_v12 = vshrl.u32 %v74_v11, 23  ;;  %v78_v18 = vand.u32 8388607, %v71_v15  ;;  %vm72_vm8 = vcmp.le.f32.partialorder %v71_v15, 0.7853982 }
 0x11b   :  { %v295_v13 = vadd.s32 4294967169, %v75_v12  ;;  %v79_v37 = vor.u32 8388608, %v78_v18 }
 0x11d   :  { %v81_v14 = vadd.s32 1, %v295_v13  ;;  %v119_v51 = vshll.u32 %v79_v37, 8 }
 0x11f   :  { %vm82_vm0 = vcmp.gt.s32.totalorder %v81_v14, 0 }
 0x120   :  { %v83_v16 = vsel %vm82_vm0, %v81_v14, 0 }
 0x121   :  { %v85_v17 = vand.u32 31, %v83_v16  ;;  %v84_v20 = vshrl.u32 %v83_v16, 5 }
 0x123   :  { %v86_v19 = vsub.s32 32, %v85_v17  ;;  %v88_v22 = vshll.u32 %v372_v21, %v85_v17  ;;  %v91_v24 = vshll.u32 %v373_v23, %v85_v17  ;;  %v94_v28 = vshll.u32 %v374_v26, %v85_v17 }
 0x124   :  { %v97_v31 = vshll.u32 %v375_v29, %v85_v17  ;;  %v100_v34 = vshll.u32 %v376_v32, %v85_v17  ;;  %vm103_vm1 = vcmp.lt.s32.totalorder %v84_v20, 1  ;;  %vm106_vm2 = vcmp.lt.s32.totalorder %v84_v20, 4 }
 0x125   :  { %v89_v25 = vshrl.u32 %v373_v23, %v86_v19  ;;  %v92_v27 = vshrl.u32 %v374_v26, %v86_v19  ;;  %v95_v30 = vshrl.u32 %v375_v29, %v86_v19  ;;  %v98_v33 = vshrl.u32 %v376_v32, %v86_v19 }
 0x126   :  { %v101_v36 = vshrl.u32 %v377_v35, %v86_v19  ;;  %v87_v46 = vshrl.u32 %v372_v21, %v86_v19  ;;  %vm105_vm3 = vcmp.lt.s32.totalorder %v84_v20, 3  ;;  %vm104_vm4 = vcmp.lt.s32.totalorder %v84_v20, 2 }
 0x127   :  { %v90_v38 = vor.u32 %v89_v25, %v88_v22  ;;  %v93_v39 = vor.u32 %v92_v27, %v91_v24  ;;  %v96_v40 = vor.u32 %v95_v30, %v94_v28  ;;  %v99_v41 = vor.u32 %v98_v33, %v97_v31 }
 0x128   :  { %v102_v42 = vor.u32 %v101_v36, %v100_v34 }
 0x129   :  { %v108_v43 = vsel %vm106_vm2, %v96_v40, 2102212464  ;;  %v111_v44 = vsel %vm103_vm1, %v90_v38, %v93_v39  ;;  %v115_v45 = vsel %vm103_vm1, %v93_v39, %v96_v40  ;;  %v112_v47 = vsel %vm106_vm2, %v99_v41, 920167782 }
 0x12a   :  { %v116_v48 = vsel %vm106_vm2, %v102_v42, 1326507024  ;;  %v113_v49 = vsel %vm105_vm3, %v96_v40, %v112_v47  ;;  %v107_v52 = vsel %vm103_vm1, %v87_v46, %v90_v38  ;;  %v109_v53 = vsel %vm105_vm3, %v93_v39, %v108_v43 }
 0x12b   :  { %v117_v50 = vsel %vm105_vm3, %v99_v41, %v116_v48  ;;  %v114_v54 = vsel %vm104_vm4, %v111_v44, %v113_v49  ;;  %v110_v60 = vsel %vm104_vm4, %v107_v52, %v109_v53 }
 0x12c   :  { %v118_v55 = vsel %vm104_vm4, %v115_v45, %v117_v50  ;;  %v418_v58 = vmul.u32.u64.low %v119_v51, %v114_v54  ;;  %v419_v59 = vmul.u32.u64.high %v119_v51, %v114_v54, %v418_v58  ;;  %v126_v62 = vmul.u32 %v119_v51, %v110_v60 }
 0x12d   :  { %v415_v56 = vmul.u32.u64.low %v119_v51, %v118_v55  ;;  %v416_v57 = vmul.u32.u64.high %v119_v51, %v118_v55, %v415_v56 }
 0x12e   :  { %v129_v61 = vadd.s32 1, %v419_v59 }
 0x12f   :  { %vm128_vm5 = vc.u32 %v416_v57, %v418_v58  ;;  %v127_v11 = vadd.s32 %v418_v58, %v416_v57 }
 0x130   :  { %v130_v63 = vsel %vm128_vm5, %v129_v61, %v419_v59 }
 0x131   :  { %v131_v0 = vadd.s32 %v130_v63, %v126_v62 }
 0x133   :  { %v132_v1 = vadd.s32 536870912, %v131_v0 }
 0x135   :  { %v133_v2 = vshrl.u32 %v132_v1, 30 }
 0x137   :  { %v134_v3 = vshll.u32 %v133_v2, 30  ;;  %v157_v24 = vsub.s32 4, %v133_v2 }
 0x139   :  { %v135_v4 = vsub.s32 %v131_v0, %v134_v3  ;;  %v158_v27 = vsel %vm73_vm7, %v157_v24, %v133_v2 }
 0x13a   :  { %v160_v29 = vsel %vm72_vm8, 0, %v158_v27 }
 0x13b   :  { %v137_v5 = vsub.s32 0, %v135_v4  ;;  %v164_v30 = vadd.s32 3, %v160_v29  ;;  %v269_v32 = vand.u32 3, %v160_v29 }
 0x13d   :  { %v296_v6 = vmin.u32 %v137_v5, %v135_v4  ;;  %v165_v31 = vand.u32 3, %v164_v30  ;;  %vm274_vm10 = vcmp.eq.s32.totalorder %v269_v32, 2  ;;  %vm271_vm12 = vcmp.eq.s32.totalorder %v269_v32, 0 }
 0x13e   :  { %vm270_vm14 = vcmp.lt.s32.totalorder %v269_v32, 2 }
 0x13f   :  { %v139_v7 = vclz %v296_v6  ;;  %vm170_vm9 = vcmp.eq.s32.totalorder %v165_v31, 2  ;;  %vm167_vm11 = vcmp.eq.s32.totalorder %v165_v31, 0  ;;  %vm166_vm13 = vcmp.lt.s32.totalorder %v165_v31, 2 }
 0x141   :  { %v297_v8 = vadd.s32 4294967294, %v139_v7 }
 0x143   :  { %vm298_vm6 = vcmp.lt.s32.totalorder %v297_v8, 0 }
 0x144   :  { %v142_v9 = vsel %vm298_vm6, 0, %v297_v8 }
 0x145   :  { %v143_v12 = vsub.s32 32, %v142_v9  ;;  %v147_v13 = vsub.s32 4294967266, %v142_v9  ;;  %v144_v14 = vshll.u32 %v135_v4, %v142_v9 }
 0x147   :  { %v145_v16 = vshrl.u32 %v127_v11, %v143_v12  ;;  %v148_v17 = vadd.s32 127, %v147_v13 }
 0x149   :  { %v146_v18 = vor.u32 %v145_v16, %v144_v14  ;;  %v149_v19 = vshll.u32 %v148_v17, 23 }
 0x14b   :  { %v150_v20 = vor.u32 4788187, %v149_v19  ;;  %v153_v22 = vcvt.s32.f32 %v146_v18 }
 0x14d   :  { %v151_v21 = vand.u32 2147483647, %v150_v20 }
 0x14f   :  { %v154_v23 = vmul.f32 %v153_v22, %v151_v21 }
 0x151   :  { %v155_v25 = vxor.u32 2147483648, %v154_v23 }
 0x153   :  { %v156_v26 = vsel %vm73_vm7, %v155_v25, %v154_v23 }
 0x154   :  { %v159_v28 = vsel %vm72_vm8, %v409_v10, %v156_v26 }
 0x155   :  { %318 = vcosq.f32 %v159_v28 }
 0x156   :  { %320 = vsinq.f32 %v159_v28 }
 0x15f   :  { %v319_v33 = vpop.eup %318 }
 0x160   :  { %v321_v34 = vpop.eup %320  ;;  %v171_v35 = vxor.u32 2147483648, %v319_v33 }
 0x161   :  { %v168_v36 = vxor.u32 2147483648, %v321_v34 }
 0x162   :  { %v172_v15 = vsel %vm170_vm9, %v171_v35, %v321_v34  ;;  %v276_v37 = vsel %vm274_vm10, %v171_v35, %v321_v34 }
 0x163   :  { %v169_v38 = vsel %vm167_vm11, %v319_v33, %v168_v36  ;;  %v273_v39 = vsel %vm271_vm12, %v319_v33, %v168_v36 }
 0x164   :  { %v173_v40 = vsel %vm166_vm13, %v169_v38, %v172_v15  ;;  %v277_v41 = vsel %vm270_vm14, %v273_v39, %v276_v37 }
 0x165   :  { %v174_v42 = vsel %vm163_vm15, nan, %v173_v40  ;;  %v278_v43 = vsel %vm163_vm15, nan, %v277_v41 }
 0x166   :  { %175 = vst [vmem:[#allocation5] sm:$0xff] %v174_v42  ;;  %279 = vst [vmem:[#allocation5 + $0x8] sm:$0xff] %v278_v43 }
 0x167   :  { %355 = shalt.err (!%p352_p12)
}
 0x168   :  { %s356_s27 = scalar_lea.hbm %s444_s2, 256 }
 0x169   :  { %p357_p13 = scmp.ne.s32.totalorder %s444_s2, %s356_s27  ;;  %p360_p0 = scmp.lt.u32.totalorder %s356_s27, %s444_s2 }
 0x16b   :  { %p362_p1 = pnand %p360_p0, %p357_p13 }
 0x16d   :  { %365 = shalt.err (!%p362_p1)
}
 0x16e   :  { %289 = dma.vmem_to_hbm [thread:$0]  %s287_s1, 256, %s444_s2, [#allocation4]  }
 0x16f   :  { %368 = dma.done.wait [#allocation4], 256  }
 0x170   :  { %369 = vsyncadd [#allocation4], 4294967040 }
 0x171   :  { %293 = vsyncpa [#allocation3], 1 }
 0x172   :  { %294 = vsyncpa [#allocation4], 1 }

</bundles_post_ra>
